<compile_context>
chip_gen: v6e
topology: v6e:2x2x1
jax: 0.10.0
libtpu: 0.0.40
codegen_flags: <defaults>
</compile_context>

<pallas_src>
import functools

import jax
import jax.numpy as jnp
from jax.experimental import pallas as pl
from jax.experimental.pallas import tpu as pltpu

_LANES = 128


def _round_up(x: int, m: int) -> int:
    return ((x + m - 1) // m) * m


def _custom_loss_kernel(o_ref, t_ref, sq_out_ref, ab_out_ref, acc_sq, acc_ab):
    # Grid = (core_split=2 [parallel], k_steps [arbitrary/reduction]).
    k = pl.program_id(1)

    @pl.when(k == 0)
    def _init():
        acc_sq[...] = jnp.zeros_like(acc_sq)
        acc_ab[...] = jnp.zeros_like(acc_ab)

    # Padded elements are zero in both inputs -> d == 0 there, no mask needed.
    d = o_ref[...].astype(jnp.float32) - t_ref[...].astype(jnp.float32)
    acc_sq[...] += d * d
    acc_ab[...] += jnp.abs(d)

    @pl.when(k == pl.num_programs(1) - 1)
    def _finalize():
        # One sublane reduction at the very end; (tm, 128) -> (1, 128).
        sq_out_ref[...] = jnp.sum(acc_sq[...], axis=0, keepdims=True)
        ab_out_ref[...] = jnp.sum(acc_ab[...], axis=0, keepdims=True)


def _custom_loss_pallas(outputs: jax.Array, targets: jax.Array, *, tile_rows: int = 2048):
    """Pallas path: returns (mse + mae, mse, mae) over the first 2 columns."""
    n, _f = outputs.shape

    # Lane-dense layout: only move the 2 used columns, flattened.
    o_flat = outputs[:, :2].reshape(-1)
    t_flat = targets[:, :2].reshape(-1)
    total = 2 * n

    rows = pl.cdiv(total, _LANES)
    rows_per_core = _round_up(pl.cdiv(rows, 2), 8)      # sublane aligned
    tm = _round_up(min(tile_rows, rows_per_core), 8)    # row tile (<= tile_rows)
    rows_per_core = _round_up(rows_per_core, tm)        # full tiles only
    padded_total = 2 * rows_per_core * _LANES

    pad = padded_total - total
    o_flat = jnp.pad(o_flat, (0, pad))
    t_flat = jnp.pad(t_flat, (0, pad))
    o3 = o_flat.reshape(2, rows_per_core, _LANES)
    t3 = t_flat.reshape(2, rows_per_core, _LANES)

    k_steps = rows_per_core // tm

    sq_part, ab_part = pl.pallas_call(
        _custom_loss_kernel,
        out_shape=(
            jax.ShapeDtypeStruct((2, 1, _LANES), jnp.float32),
            jax.ShapeDtypeStruct((2, 1, _LANES), jnp.float32),
        ),
        grid_spec=pltpu.PrefetchScalarGridSpec(
            num_scalar_prefetch=0,
            grid=(2, k_steps),
            in_specs=[
                pl.BlockSpec((None, tm, _LANES), lambda p, k: (p, k, 0)),
                pl.BlockSpec((None, tm, _LANES), lambda p, k: (p, k, 0)),
            ],
            out_specs=[
                pl.BlockSpec((None, 1, _LANES), lambda p, k: (p, 0, 0)),
                pl.BlockSpec((None, 1, _LANES), lambda p, k: (p, 0, 0)),
            ],
            scratch_shapes=[
                pltpu.VMEM((tm, _LANES), jnp.float32),
                pltpu.VMEM((tm, _LANES), jnp.float32),
            ],
        ),
        compiler_params=pltpu.CompilerParams(
            dimension_semantics=("parallel", "arbitrary"),
        ),
    )(o3, t3)

    denom = jnp.float32(1.0 / (n * 2))  # mean over N rows x 2 columns
    mse = jnp.sum(sq_part) * denom
    mae = jnp.sum(ab_part) * denom
    return mse + mae, mse, mae


def custom_loss(outputs: jax.Array, targets: jax.Array, *,
                tile_rows: int = 2048, min_pallas_elements: int = 2048):
    """CustomLoss forward: (mse + mae, mse, mae) over outputs[:, :2] / targets[:, :2]."""
    assert outputs.shape == targets.shape and outputs.ndim == 2
    assert outputs.shape[1] >= 2
    n = outputs.shape[0]

    if 2 * n < min_pallas_elements:
        # Tiny input: pallas_call fixed overhead exceeds the work; plain XLA.
        d = (outputs[:, :2] - targets[:, :2]).astype(jnp.float32)
        mse = jnp.mean(d * d)
        mae = jnp.mean(jnp.abs(d))
        return mse + mae, mse, mae

    return _custom_loss_pallas(outputs, targets, tile_rows=tile_rows)


def _reference(outputs, targets):
    d = (outputs[:, :2] - targets[:, :2]).astype(jnp.float32)
    mse = jnp.mean(d * d)
    mae = jnp.mean(jnp.abs(d))
    return mse + mae, mse, mae


if __name__ == "__main__":
    key = jax.random.PRNGKey(0)
    k1, k2, k3, k4, k5, k6 = jax.random.split(key, 6)

    # 1) Main check: exercises the Pallas kernel path (single k-step per core).
    outputs = jax.random.normal(k1, (2048, 6), dtype=jnp.float32)
    targets = jax.random.normal(k2, (2048, 6), dtype=jnp.float32)
    total, mse, mae = jax.jit(custom_loss)(outputs, targets)
    jax.block_until_ready((total, mse, mae))
    rt, rm, ra = _reference(outputs, targets)
    assert jnp.allclose(mse, rm, rtol=1e-5, atol=1e-6)
    assert jnp.allclose(mae, ra, rtol=1e-5, atol=1e-6)
    assert jnp.allclose(total, rt, rtol=1e-5, atol=1e-6)

    # 2) Multi-step accumulation along the reduction axis (small tile on purpose).
    o2 = jax.random.normal(k3, (8192, 4), dtype=jnp.float32)
    t2 = jax.random.normal(k4, (8192, 4), dtype=jnp.float32)
    total2, mse2, mae2 = jax.jit(
        functools.partial(custom_loss, tile_rows=32))(o2, t2)
    jax.block_until_ready((total2, mse2, mae2))
    rt2, rm2, ra2 = _reference(o2, t2)
    assert jnp.allclose(mse2, rm2, rtol=1e-5, atol=1e-6)
    assert jnp.allclose(mae2, ra2, rtol=1e-5, atol=1e-6)
    assert jnp.allclose(total2, rt2, rtol=1e-5, atol=1e-6)

    # 3) Tiny input forced through the kernel path (exercises zero-padding).
    o3 = jax.random.normal(k5, (8, 4), dtype=jnp.float32)
    t3 = jax.random.normal(k6, (8, 4), dtype=jnp.float32)
    total3, mse3, mae3 = jax.jit(_custom_loss_pallas)(o3, t3)
    jax.block_until_ready((total3, mse3, mae3))
    rt3, rm3, ra3 = _reference(o3, t3)
    assert jnp.allclose(mse3, rm3, rtol=1e-5, atol=1e-6)
    assert jnp.allclose(mae3, ra3, rtol=1e-5, atol=1e-6)
    assert jnp.allclose(total3, rt3, rtol=1e-5, atol=1e-6)

    print("KERNEL_OK")
</pallas_src>

<mosaic_0001>
module attributes {stable_mosaic.version = 11 : i64} {
  func.func @_custom_loss_kernel(%arg0: i32, %arg1: i32, %arg2: memref<1x16x128xf32, #tpu.memory_space<vmem>>, %arg3: memref<1x16x128xf32, #tpu.memory_space<vmem>>, %arg4: memref<1x1x128xf32, #tpu.memory_space<vmem>>, %arg5: memref<1x1x128xf32, #tpu.memory_space<vmem>>, %arg6: memref<16x128xf32, #tpu.memory_space<vmem>>, %arg7: memref<16x128xf32, #tpu.memory_space<vmem>>) attributes {dimension_semantics = [#tpu.dimension_semantics<parallel>, #tpu.dimension_semantics<arbitrary>], iteration_bounds = array<i64: 2, 1>, scalar_prefetch = 0 : i64, scratch_operands = 2 : i64, tpu.core_type = #tpu.core_type<tc>, window_params = [{transform_indices = @transform_0, window_bounds = array<i64: 1, 16, 128>}, {transform_indices = @transform_1, window_bounds = array<i64: 1, 16, 128>}, {transform_indices = @transform_2, window_bounds = array<i64: 1, 1, 128>}, {transform_indices = @transform_3, window_bounds = array<i64: 1, 1, 128>}]} {
    %c0_i32 = arith.constant 0 : i32
    %0 = arith.cmpi eq, %arg1, %c0_i32 : i32
    %1 = arith.extui %0 : i1 to i32
    %c0_i32_0 = arith.constant 0 : i32
    %2 = arith.cmpi ne, %1, %c0_i32_0 : i32
    scf.if %2 {
      %cst = arith.constant 0.000000e+00 : f32
      %19 = vector.broadcast %cst : f32 to vector<16x128xf32>
      %c0_16 = arith.constant 0 : index
      %c0_17 = arith.constant 0 : index
      %20 = vector.load %arg6[%c0_16, %c0_17] : memref<16x128xf32, #tpu.memory_space<vmem>>, vector<16x128xf32>
      tpu.vector_store %arg6[%c0_16, %c0_17], %19 {strides = array<i32>} : memref<16x128xf32, #tpu.memory_space<vmem>>, vector<16x128xf32>,
      %cst_18 = arith.constant 0.000000e+00 : f32
      %21 = vector.broadcast %cst_18 : f32 to vector<16x128xf32>
      %c0_19 = arith.constant 0 : index
      %c0_20 = arith.constant 0 : index
      %22 = vector.load %arg7[%c0_19, %c0_20] : memref<16x128xf32, #tpu.memory_space<vmem>>, vector<16x128xf32>
      tpu.vector_store %arg7[%c0_19, %c0_20], %21 {strides = array<i32>} : memref<16x128xf32, #tpu.memory_space<vmem>>, vector<16x128xf32>,
    } else {
    }
    %c0 = arith.constant 0 : index
    %c0_1 = arith.constant 0 : index
    %c0_2 = arith.constant 0 : index
    %3 = vector.load %arg2[%c0, %c0_1, %c0_2] : memref<1x16x128xf32, #tpu.memory_space<vmem>>, vector<1x16x128xf32>
    %4 = vector.shape_cast %3 : vector<1x16x128xf32> to vector<16x128xf32>
    %c0_3 = arith.constant 0 : index
    %c0_4 = arith.constant 0 : index
    %c0_5 = arith.constant 0 : index
    %5 = vector.load %arg3[%c0_3, %c0_4, %c0_5] : memref<1x16x128xf32, #tpu.memory_space<vmem>>, vector<1x16x128xf32>
    %6 = vector.shape_cast %5 : vector<1x16x128xf32> to vector<16x128xf32>
    %7 = arith.subf %4, %6 : vector<16x128xf32>
    %c0_6 = arith.constant 0 : index
    %c0_7 = arith.constant 0 : index
    %8 = vector.load %arg6[%c0_6, %c0_7] : memref<16x128xf32, #tpu.memory_space<vmem>>, vector<16x128xf32>
    %9 = arith.mulf %7, %7 : vector<16x128xf32>
    %10 = arith.addf %8, %9 : vector<16x128xf32>
    %c0_8 = arith.constant 0 : index
    %c0_9 = arith.constant 0 : index
    %11 = vector.load %arg6[%c0_8, %c0_9] : memref<16x128xf32, #tpu.memory_space<vmem>>, vector<16x128xf32>
    tpu.vector_store %arg6[%c0_8, %c0_9], %10 {strides = array<i32>} : memref<16x128xf32, #tpu.memory_space<vmem>>, vector<16x128xf32>,
    %c0_10 = arith.constant 0 : index
    %c0_11 = arith.constant 0 : index
    %12 = vector.load %arg7[%c0_10, %c0_11] : memref<16x128xf32, #tpu.memory_space<vmem>>, vector<16x128xf32>
    %13 = math.absf %7 : vector<16x128xf32>
    %14 = arith.addf %12, %13 : vector<16x128xf32>
    %c0_12 = arith.constant 0 : index
    %c0_13 = arith.constant 0 : index
    %15 = vector.load %arg7[%c0_12, %c0_13] : memref<16x128xf32, #tpu.memory_space<vmem>>, vector<16x128xf32>
    tpu.vector_store %arg7[%c0_12, %c0_13], %14 {strides = array<i32>} : memref<16x128xf32, #tpu.memory_space<vmem>>, vector<16x128xf32>,
    %c0_i32_14 = arith.constant 0 : i32
    %16 = arith.cmpi eq, %arg1, %c0_i32_14 : i32
    %17 = arith.extui %16 : i1 to i32
    %c0_i32_15 = arith.constant 0 : i32
    %18 = arith.cmpi ne, %17, %c0_i32_15 : i32
    scf.if %18 {
      %c0_16 = arith.constant 0 : index
      %c0_17 = arith.constant 0 : index
      %19 = vector.load %arg6[%c0_16, %c0_17] : memref<16x128xf32, #tpu.memory_space<vmem>>, vector<16x128xf32>
      %cst = arith.constant dense<0.000000e+00> : vector<128xf32>
      %20 = vector.multi_reduction <add>, %19, %cst [0] : vector<16x128xf32> to vector<128xf32>
      %21 = vector.shape_cast %20 : vector<128xf32> to vector<1x128xf32>
      %c0_18 = arith.constant 0 : index
      %c0_19 = arith.constant 0 : index
      %c0_20 = arith.constant 0 : index
      %22 = vector.load %arg4[%c0_18, %c0_19, %c0_20] : memref<1x1x128xf32, #tpu.memory_space<vmem>>, vector<1x1x128xf32>
      %23 = vector.shape_cast %22 : vector<1x1x128xf32> to vector<1x128xf32>
      %24 = vector.shape_cast %21 : vector<1x128xf32> to vector<1x1x128xf32>
      tpu.vector_store %arg4[%c0_18, %c0_19, %c0_20], %24 {strides = array<i32>} : memref<1x1x128xf32, #tpu.memory_space<vmem>>, vector<1x1x128xf32>,
      %c0_21 = arith.constant 0 : index
      %c0_22 = arith.constant 0 : index
      %25 = vector.load %arg7[%c0_21, %c0_22] : memref<16x128xf32, #tpu.memory_space<vmem>>, vector<16x128xf32>
      %cst_23 = arith.constant dense<0.000000e+00> : vector<128xf32>
      %26 = vector.multi_reduction <add>, %25, %cst_23 [0] : vector<16x128xf32> to vector<128xf32>
      %27 = vector.shape_cast %26 : vector<128xf32> to vector<1x128xf32>
      %c0_24 = arith.constant 0 : index
      %c0_25 = arith.constant 0 : index
      %c0_26 = arith.constant 0 : index
      %28 = vector.load %arg5[%c0_24, %c0_25, %c0_26] : memref<1x1x128xf32, #tpu.memory_space<vmem>>, vector<1x1x128xf32>
      %29 = vector.shape_cast %28 : vector<1x1x128xf32> to vector<1x128xf32>
      %30 = vector.shape_cast %27 : vector<1x128xf32> to vector<1x1x128xf32>
      tpu.vector_store %arg5[%c0_24, %c0_25, %c0_26], %30 {strides = array<i32>} : memref<1x1x128xf32, #tpu.memory_space<vmem>>, vector<1x1x128xf32>,
    } else {
    }
    return
  }
  func.func @transform_0(%arg0: i32, %arg1: i32) -> (i32, i32, i32) {
    %c0_i32 = arith.constant 0 : i32
    %c0_i32_0 = arith.constant 0 : i32
    return %arg0, %arg1, %c0_i32 : i32, i32, i32
  }
  func.func @transform_1(%arg0: i32, %arg1: i32) -> (i32, i32, i32) {
    %c0_i32 = arith.constant 0 : i32
    %c0_i32_0 = arith.constant 0 : i32
    return %arg0, %arg1, %c0_i32 : i32, i32, i32
  }
  func.func @transform_2(%arg0: i32, %arg1: i32) -> (i32, i32, i32) {
    %c0_i32 = arith.constant 0 : i32
    %c0_i32_0 = arith.constant 0 : i32
    %c0_i32_1 = arith.constant 0 : i32
    return %arg0, %c0_i32, %c0_i32_0 : i32, i32, i32
  }
  func.func @transform_3(%arg0: i32, %arg1: i32) -> (i32, i32, i32) {
    %c0_i32 = arith.constant 0 : i32
    %c0_i32_0 = arith.constant 0 : i32
    %c0_i32_1 = arith.constant 0 : i32
    return %arg0, %c0_i32, %c0_i32_0 : i32, i32, i32
  }
}

</mosaic_0001>

<bundles_post_ra>
// kernel: custom_loss.1
= control target key start
LH: loop header
LB: loop body
LE: loop exit
PB: predicated region body
PF: predicated region fallthrough
CT: control target
= control target key end

     0   :  { %s478_s12 = smov 0   ;;  %s480_s13 = smov 0   ;;  %s522_s0 = inlined_call_operand.vmem [shape: f32[2,16,128], index: 0, kind: input, shape index: {}]   ;;  %s523_s1 = inlined_call_operand.vmem [shape: f32[2,16,128], index: 1, kind: input, shape index: {}]   ;;  %s524_s2 = inlined_call_operand.vmem [shape: f32[2,1,128], index: 2, kind: output, shape index: {0}]   ;;  %s525_s3 = inlined_call_operand.vmem [shape: f32[2,1,128], index: 3, kind: output, shape index: {1}]  }
   0x1   :  { %s482_s14 = smov 0  }
   0x2 LB: > { %s26_s15 = sadd.s32 1, %s452_s13  ;;  %p401_p0 = scmp.ge.s32.totalorder %s456_s14, 1  ;;  %s456_s14 = sphi %s482_s14, %s14_s14   ;;  %s452_s13 = sphi %s480_s13, %s527_s13   ;;  %s448_s12 = sphi %s478_s12, %s526_s12  }
   0x3   : > { %p28_p1 = scmp.ge.s32.totalorder %s26_s15, 2  ;;  %p176_p2 = scmp.lt.s32.totalorder %s456_s14, 3 }
   0x5   : > { %s529_s15 = smov (%p28_p1, %s26_s15), 0  ;;  %p177_p3 = pnand %p401_p0, %p176_p2 }
   0x6   : > { %p215_p4 = scmp.lt.s32.totalorder (!%p177_p3), %s448_s12, 1 }
   0x7   : > { %180 = sbr.rel (%p177_p3) target bundleno = 36 (0x24), region = 28 }
   0xc   : > { %s531_s12 = smov (!%p215_p4, %s448_s12), 1 }
   0xd   : > { %s408_s16 = sshll.u32 %s531_s12, 4  ;;  %s236_s25 = scalar_lea.vmem %s524_s2, %s531_s12 }
   0xe   : > { %s222_s19 = scalar_lea.vmem %s522_s0, %s408_s16  ;;  %s232_s22 = scalar_lea.vmem %s523_s1, %s408_s16 }
   0xf   : > { %v248_v0 = vld [vmem:[%s222_s19] sm:$0xff]  ;;  %v249_v1 = vld [vmem:[%s222_s19 + $0x8] sm:$0xff]  ;;  %s239_s28 = scalar_lea.vmem %s525_s3, %s531_s12 }
  0x10   : > { %v250_v2 = vld [vmem:[%s232_s22] sm:$0xff]  ;;  %v251_v3 = vld [vmem:[%s232_s22 + $0x8] sm:$0xff] }
  0x11   : > { %v252_v4 = vsub.f32 %v248_v0, %v250_v2  ;;  %v253_v5 = vsub.f32 %v249_v1, %v251_v3 }
  0x13   : > { %v256_v6 = vmul.f32 %v252_v4, %v252_v4  ;;  %v264_v7 = vand.u32 2147483647, %v252_v4  ;;  %v257_v8 = vmul.f32 %v253_v5, %v253_v5  ;;  %v265_v9 = vand.u32 2147483647, %v253_v5 }
  0x15   : > { %v275_v10 = vadd.f32 %v257_v8, %v256_v6  ;;  %v285_v11 = vadd.f32 %v265_v9, %v264_v7 }
  0x17   : > { %v276_v12 = vrot.slane %v275_v10, 4  ;;  %v286_v13 = vrot.slane %v285_v11, 4 }
  0x19   : > { %v277_v14 = vadd.f32 %v276_v12, %v275_v10  ;;  %v287_v15 = vadd.f32 %v286_v13, %v285_v11 }
  0x1b   : > { %v278_v16 = vrot.slane %v277_v14, 2  ;;  %v288_v17 = vrot.slane %v287_v15, 2 }
  0x1d   : > { %v279_v18 = vadd.f32 %v278_v16, %v277_v14  ;;  %v289_v19 = vadd.f32 %v288_v17, %v287_v15 }
  0x1f   : > { %v280_v20 = vrot.slane %v279_v18, 1  ;;  %v290_v21 = vrot.slane %v289_v19, 1 }
  0x21   : > { %v281_v22 = vadd.f32 %v280_v20, %v279_v18  ;;  %v291_v23 = vadd.f32 %v290_v21, %v289_v19 }
  0x23   : > { %282 = vst [vmem:[%s236_s25] sm:$0x1] %v281_v22  ;;  %292 = vst [vmem:[%s239_s28] sm:$0x1] %v291_v23 }
  0x24 PF: > { %s14_s14 = sadd.s32 1, %s456_s14   ;;  %s526_s12 = smov %s452_s13 }
  0x25   : > { %p11_p5 = scmp.ge.s32.totalorder %s14_s14, 4   ;;  %s527_s13 = smov %s529_s15 }
  0x27   :  { %13 = sbr.rel (!%p11_p5) target bundleno = 2 (0x2), region = 81 }

</bundles_post_ra>
